<compile_context>
chip_gen: v5e
topology: v5e:2x2
jax: 0.10.0
libtpu: 0.0.40
codegen_flags: <defaults>
</compile_context>

<pallas_src>
import math

import jax
import jax.numpy as jnp
from jax.experimental import pallas as pl
from jax.experimental.pallas import tpu as pltpu

H1, H2, H2_PAD = 512, 100, 128  # hidden sizes; 100 is lane-padded to 128


def mlp_kernel(x_ref, w1_ref, b1_ref, w2_ref, b2_ref, w3_ref, b3_ref, o_ref):
    # Layer 1: (TILE_B, n_in) @ (n_in, 512) + b1, ReLU.  bf16 operands, f32 accumulate.
    h1 = jnp.dot(x_ref[...], w1_ref[...], preferred_element_type=jnp.float32)
    h1 = jnp.maximum(h1 + b1_ref[...], 0.0)
    # Layer 2: (TILE_B, 512) @ (512, 128)  (100 -> 128 zero-padded lanes) + b2, ReLU.
    h2 = jnp.dot(h1.astype(jnp.bfloat16), w2_ref[...],
                 preferred_element_type=jnp.float32)
    h2 = jnp.maximum(h2 + b2_ref[...], 0.0)
    # Layer 3: (1, 128) contracted with the 128-lane axis of (TILE_B, 128) -> (1, TILE_B).
    # This is the rhs-transposed MXU form and gives a lane-dense output row directly.
    logits = jax.lax.dot_general(
        w3_ref[...], h2.astype(jnp.bfloat16),
        dimension_numbers=(((1,), (1,)), ((), ())),
        preferred_element_type=jnp.float32,
    ) + b3_ref[...]
    # Sigmoid (exp on EUP; exact divide keeps bitwise-tight agreement with reference).
    o_ref[...] = 1.0 / (1.0 + jnp.exp(-logits))


def _round_up(x, m):
    return (x + m - 1) // m * m


def _default_tile_b():
    kind = jax.devices()[0].device_kind.lower()
    if "v5" in kind or "v6" in kind:
        return 4096   # 128 MiB VMEM: large tiles amortize ~600-cycle per-step overhead
    return 2048       # v7x (64 MiB VMEM) and unknown chips: stay conservative


def mlp_forward(x, params, *, tile_b=None):
    """x: (B, n_inputs) float array; returns (B, 1) float32 sigmoid outputs."""
    w1, b1, w2, b2, w3, b3 = params
    B, n_in = x.shape
    if tile_b is None:
        tile_b = _default_tile_b()
    # Tile must be a multiple of 128 (lanes of the output row / sublanes of x).
    tile_b = max(128, min(tile_b, _round_up(B, 128)))
    b_pad = _round_up(B, tile_b)

    xb = x.astype(jnp.bfloat16)                       # halve HBM traffic for the stream
    if b_pad != B:
        xb = jnp.pad(xb, ((0, b_pad - B), (0, 0)))    # zero rows -> finite junk, sliced off
    num_tiles = b_pad // tile_b

    def resident(shape):
        # Constant block index -> DMA'd once, stays in VMEM for the whole grid.
        return pl.BlockSpec(shape, lambda i: (0, 0))

    in_specs = [
        pl.BlockSpec((tile_b, n_in), lambda i: (i, 0)),   # x: streamed per batch tile
        resident(w1.shape), resident(b1.shape),
        resident(w2.shape), resident(b2.shape),
        resident(w3.shape), resident(b3.shape),
    ]
    # Lane-dense output: one (1, tile_b) row slab per grid step of a (1, b_pad) array.
    out_specs = pl.BlockSpec((1, tile_b), lambda i: (0, i))

    flops = 2 * b_pad * (n_in * H1 + H1 * H2_PAD + H2_PAD)
    bytes_accessed = int(
        b_pad * n_in * 2 + b_pad * 4
        + (w1.size + w2.size + w3.size) * 2
        + (b1.size + b2.size + b3.size) * 4
    )

    out = pl.pallas_call(
        mlp_kernel,
        grid=(num_tiles,),
        in_specs=in_specs,
        out_specs=out_specs,
        out_shape=jax.ShapeDtypeStruct((1, b_pad), jnp.float32),
        compiler_params=pltpu.CompilerParams(
            dimension_semantics=("parallel",),        # megacore-shard batch tiles (v7x)
            vmem_limit_bytes=32 * 1024 * 1024,
        ),
        cost_estimate=pl.CostEstimate(
            flops=int(flops),
            transcendentals=int(b_pad),
            bytes_accessed=bytes_accessed,
        ),
    )(xb, w1, b1, w2, b2, w3, b3)

    return out.reshape(b_pad, 1)[:B]


def init_params(key, n_inputs):
    """Mirror the PyTorch module's init scheme.  Weights are stored transposed
    (in_features, out_features); the 100-wide layer is zero-padded to 128 so the
    padded lanes compute exact zeros through ReLU and contribute 0 to layer 3."""
    k = jax.random.split(key, 6)

    def kaiming_uniform_relu(key, fan_in, fan_out):
        bound = math.sqrt(2.0) * math.sqrt(3.0 / fan_in)
        return jax.random.uniform(key, (fan_in, fan_out), jnp.float32, -bound, bound)

    def xavier_uniform(key, fan_in, fan_out):
        bound = math.sqrt(6.0 / (fan_in + fan_out))
        return jax.random.uniform(key, (fan_in, fan_out), jnp.float32, -bound, bound)

    def bias_init(key, fan_in, fan_out):
        bound = 1.0 / math.sqrt(fan_in)
        return jax.random.uniform(key, (1, fan_out), jnp.float32, -bound, bound)

    w1 = kaiming_uniform_relu(k[0], n_inputs, H1)
    b1 = bias_init(k[1], n_inputs, H1)
    w2 = jnp.zeros((H1, H2_PAD), jnp.float32).at[:, :H2].set(
        kaiming_uniform_relu(k[2], H1, H2))
    b2 = jnp.zeros((1, H2_PAD), jnp.float32).at[:, :H2].set(
        bias_init(k[3], H1, H2))
    # Layer 3 weight stored as a zero-padded (1, 128) row (used in the A @ B.T form).
    w3 = jnp.zeros((1, H2_PAD), jnp.float32).at[:, :H2].set(
        xavier_uniform(k[4], H2, 1)[:, 0])
    b3 = bias_init(k[5], H2, 1)   # (1, 1)
    # bf16 weights (MXU native rate); f32 biases.
    return (w1.astype(jnp.bfloat16), b1,
            w2.astype(jnp.bfloat16), b2,
            w3.astype(jnp.bfloat16), b3)


def ref_forward(x, params):
    """Plain-JAX reference using the same bf16 weights / casts as the kernel."""
    w1, b1, w2, b2, w3, b3 = params
    xb = x.astype(jnp.bfloat16)
    h1 = jnp.maximum(jnp.dot(xb, w1, preferred_element_type=jnp.float32) + b1, 0.0)
    h2 = jnp.maximum(jnp.dot(h1.astype(jnp.bfloat16), w2,
                             preferred_element_type=jnp.float32) + b2, 0.0)
    logits = jnp.dot(h2.astype(jnp.bfloat16), w3.T,
                     preferred_element_type=jnp.float32) + b3
    return 1.0 / (1.0 + jnp.exp(-logits))


if __name__ == "__main__":
    key = jax.random.PRNGKey(0)
    n_inputs = 32
    batch = 300   # deliberately not a multiple of the tile: exercises padding + grid

    pkey, xkey = jax.random.split(key)
    params = init_params(pkey, n_inputs)
    x = jax.random.normal(xkey, (batch, n_inputs), dtype=jnp.float32)

    # Small tile in the demo (-> 3 grid steps); production uses the per-gen default.
    out = mlp_forward(x, params, tile_b=128)
    out = jax.block_until_ready(out)

    ref = ref_forward(x, params)
    assert out.shape == (batch, 1), out.shape
    assert bool(jnp.all(jnp.isfinite(out)))
    assert jnp.allclose(out, ref, atol=2e-3, rtol=2e-3), \
        float(jnp.max(jnp.abs(out - ref)))

    print("KERNEL_OK")
</pallas_src>

<mosaic_0001>
module attributes {stable_mosaic.version = 11 : i64} {
  func.func @mlp_kernel(%arg0: i32, %arg1: memref<128x32xbf16, #tpu.memory_space<vmem>>, %arg2: memref<32x512xbf16, #tpu.memory_space<vmem>>, %arg3: memref<1x512xf32, #tpu.memory_space<vmem>>, %arg4: memref<512x128xbf16, #tpu.memory_space<vmem>>, %arg5: memref<1x128xf32, #tpu.memory_space<vmem>>, %arg6: memref<1x128xbf16, #tpu.memory_space<vmem>>, %arg7: memref<1x1xf32, #tpu.memory_space<vmem>>, %arg8: memref<1x128xf32, #tpu.memory_space<vmem>>) attributes {dimension_semantics = [#tpu.dimension_semantics<parallel>], iteration_bounds = array<i64: 3>, scalar_prefetch = 0 : i64, scratch_operands = 0 : i64, tpu.core_type = #tpu.core_type<tc>, window_params = [{transform_indices = @transform_0, window_bounds = array<i64: 128, 32>}, {pipeline_mode = #tpu.pipeline_mode<synchronous>, transform_indices = @transform_1, window_bounds = array<i64: 32, 512>}, {pipeline_mode = #tpu.pipeline_mode<synchronous>, transform_indices = @transform_2, window_bounds = array<i64: 1, 512>}, {pipeline_mode = #tpu.pipeline_mode<synchronous>, transform_indices = @transform_3, window_bounds = array<i64: 512, 128>}, {pipeline_mode = #tpu.pipeline_mode<synchronous>, transform_indices = @transform_4, window_bounds = array<i64: 1, 128>}, {pipeline_mode = #tpu.pipeline_mode<synchronous>, transform_indices = @transform_5, window_bounds = array<i64: 1, 128>}, {pipeline_mode = #tpu.pipeline_mode<synchronous>, transform_indices = @transform_6, window_bounds = array<i64: 1, 1>}, {transform_indices = @transform_7, window_bounds = array<i64: 1, 128>}]} {
    %c0 = arith.constant 0 : index
    %c0_0 = arith.constant 0 : index
    %0 = vector.load %arg1[%c0, %c0_0] : memref<128x32xbf16, #tpu.memory_space<vmem>>, vector<128x32xbf16>
    %c0_1 = arith.constant 0 : index
    %c0_2 = arith.constant 0 : index
    %1 = vector.load %arg2[%c0_1, %c0_2] : memref<32x512xbf16, #tpu.memory_space<vmem>>, vector<32x512xbf16>
    %cst = arith.constant dense<0.000000e+00> : vector<128x512xf32>
    %2 = tpu.matmul %0, %1, %cst {dimension_numbers = #tpu.dot_dimension_numbers<[1], [0], [0], [1], [0, 0, 1, 1], [], []>} : vector<128x32xbf16>, vector<32x512xbf16>, vector<128x512xf32> -> vector<128x512xf32>
    %c0_3 = arith.constant 0 : index
    %c0_4 = arith.constant 0 : index
    %3 = vector.load %arg3[%c0_3, %c0_4] : memref<1x512xf32, #tpu.memory_space<vmem>>, vector<1x512xf32>
    %4 = vector.broadcast %3 : vector<1x512xf32> to vector<128x512xf32>
    %5 = arith.addf %2, %4 : vector<128x512xf32>
    %cst_5 = arith.constant 0.000000e+00 : f32
    %6 = vector.broadcast %cst_5 : f32 to vector<128x512xf32>
    %7 = arith.maximumf %5, %6 : vector<128x512xf32>
    %8 = arith.truncf %7 : vector<128x512xf32> to vector<128x512xbf16>
    %c0_6 = arith.constant 0 : index
    %c0_7 = arith.constant 0 : index
    %9 = vector.load %arg4[%c0_6, %c0_7] : memref<512x128xbf16, #tpu.memory_space<vmem>>, vector<512x128xbf16>
    %cst_8 = arith.constant dense<0.000000e+00> : vector<128x128xf32>
    %10 = tpu.matmul %8, %9, %cst_8 {dimension_numbers = #tpu.dot_dimension_numbers<[1], [0], [0], [1], [0, 0, 1, 1], [], []>} : vector<128x512xbf16>, vector<512x128xbf16>, vector<128x128xf32> -> vector<128x128xf32>
    %c0_9 = arith.constant 0 : index
    %c0_10 = arith.constant 0 : index
    %11 = vector.load %arg5[%c0_9, %c0_10] : memref<1x128xf32, #tpu.memory_space<vmem>>, vector<1x128xf32>
    %12 = vector.broadcast %11 : vector<1x128xf32> to vector<128x128xf32>
    %13 = arith.addf %10, %12 : vector<128x128xf32>
    %cst_11 = arith.constant 0.000000e+00 : f32
    %14 = vector.broadcast %cst_11 : f32 to vector<128x128xf32>
    %15 = arith.maximumf %13, %14 : vector<128x128xf32>
    %c0_12 = arith.constant 0 : index
    %c0_13 = arith.constant 0 : index
    %16 = vector.load %arg6[%c0_12, %c0_13] : memref<1x128xbf16, #tpu.memory_space<vmem>>, vector<1x128xbf16>
    %17 = arith.truncf %15 : vector<128x128xf32> to vector<128x128xbf16>
    %cst_14 = arith.constant dense<0.000000e+00> : vector<1x128xf32>
    %18 = tpu.matmul %16, %17, %cst_14 {dimension_numbers = #tpu.dot_dimension_numbers<[1], [1], [0], [0], [0, 0, 1, 0], [], []>} : vector<1x128xbf16>, vector<128x128xbf16>, vector<1x128xf32> -> vector<1x128xf32>
    %c0_15 = arith.constant 0 : index
    %c0_16 = arith.constant 0 : index
    %19 = vector.load %arg7[%c0_15, %c0_16] : memref<1x1xf32, #tpu.memory_space<vmem>>, vector<1x1xf32>
    %20 = vector.broadcast %19 : vector<1x1xf32> to vector<1x128xf32>
    %21 = arith.addf %18, %20 : vector<1x128xf32>
    %cst_17 = arith.constant 0.000000e+00 : f32
    %22 = vector.broadcast %cst_17 : f32 to vector<1x128xf32>
    %23 = arith.subf %22, %21 : vector<1x128xf32>
    %24 = math.exp %23 : vector<1x128xf32>
    %cst_18 = arith.constant 1.000000e+00 : f32
    %25 = vector.broadcast %cst_18 : f32 to vector<1x128xf32>
    %26 = arith.addf %25, %24 : vector<1x128xf32>
    %cst_19 = arith.constant 1.000000e+00 : f32
    %27 = vector.broadcast %cst_19 : f32 to vector<1x128xf32>
    %28 = arith.divf %27, %26 : vector<1x128xf32>
    %c0_20 = arith.constant 0 : index
    %c0_21 = arith.constant 0 : index
    %29 = vector.load %arg8[%c0_20, %c0_21] : memref<1x128xf32, #tpu.memory_space<vmem>>, vector<1x128xf32>
    tpu.vector_store %arg8[%c0_20, %c0_21], %28 {strides = array<i32>} : memref<1x128xf32, #tpu.memory_space<vmem>>, vector<1x128xf32>,
    return
  }
  func.func @transform_0(%arg0: i32) -> (i32, i32) {
    %c0_i32 = arith.constant 0 : i32
    %c0_i32_0 = arith.constant 0 : i32
    return %arg0, %c0_i32 : i32, i32
  }
  func.func @transform_1(%arg0: i32) -> (i32, i32) {
    %c0_i32 = arith.constant 0 : i32
    %c0_i32_0 = arith.constant 0 : i32
    %c0_i32_1 = arith.constant 0 : i32
    return %c0_i32, %c0_i32_0 : i32, i32
  }
  func.func @transform_2(%arg0: i32) -> (i32, i32) {
    %c0_i32 = arith.constant 0 : i32
    %c0_i32_0 = arith.constant 0 : i32
    %c0_i32_1 = arith.constant 0 : i32
    return %c0_i32, %c0_i32_0 : i32, i32
  }
  func.func @transform_3(%arg0: i32) -> (i32, i32) {
    %c0_i32 = arith.constant 0 : i32
    %c0_i32_0 = arith.constant 0 : i32
    %c0_i32_1 = arith.constant 0 : i32
    return %c0_i32, %c0_i32_0 : i32, i32
  }
  func.func @transform_4(%arg0: i32) -> (i32, i32) {
    %c0_i32 = arith.constant 0 : i32
    %c0_i32_0 = arith.constant 0 : i32
    %c0_i32_1 = arith.constant 0 : i32
    return %c0_i32, %c0_i32_0 : i32, i32
  }
  func.func @transform_5(%arg0: i32) -> (i32, i32) {
    %c0_i32 = arith.constant 0 : i32
    %c0_i32_0 = arith.constant 0 : i32
    %c0_i32_1 = arith.constant 0 : i32
    return %c0_i32, %c0_i32_0 : i32, i32
  }
  func.func @transform_6(%arg0: i32) -> (i32, i32) {
    %c0_i32 = arith.constant 0 : i32
    %c0_i32_0 = arith.constant 0 : i32
    %c0_i32_1 = arith.constant 0 : i32
    return %c0_i32, %c0_i32_0 : i32, i32
  }
  func.func @transform_7(%arg0: i32) -> (i32, i32) {
    %c0_i32 = arith.constant 0 : i32
    %c0_i32_0 = arith.constant 0 : i32
    return %c0_i32, %arg0 : i32, i32
  }
}

</mosaic_0001>

<bundles_post_ra>
// kernel: tpu_custom_call.1
= control target key start
LH: loop header
LB: loop body
LE: loop exit
PB: predicated region body
PF: predicated region fallthrough
CT: control target
= control target key end

     0   :  { %s2111_s0 = inlined_call_operand.vmem [shape: bf16[384,32], index: 0, kind: input, shape index: {}]   ;;  %s2112_s1 = inlined_call_operand.vmem [shape: bf16[32,512], index: 1, kind: input, shape index: {}]   ;;  %s2113_s2 = inlined_call_operand.vmem [shape: f32[1,512], index: 2, kind: input, shape index: {}]   ;;  %s2114_s3 = inlined_call_operand.hbm [shape: bf16[512,128], index: 3, kind: input, shape index: {}]   ;;  %s2115_s4 = inlined_call_operand.vmem [shape: f32[1,128], index: 4, kind: input, shape index: {}]   ;;  %s2116_s5 = inlined_call_operand.vmem [shape: bf16[1,128], index: 5, kind: input, shape index: {}]   ;;  %s2117_s6 = inlined_call_operand.<no memory space> [shape: f32[1,1], index: 6, kind: input, shape index: {}]   ;;  %s2118_s7 = inlined_call_operand.hbm [shape: f32[1,384], index: 7, kind: output, shape index: {}]  }
   0x1   :  { %v12_v0 = vstv %s2117_s6 }
   0x2   :  { %13 = vst [vmem:[#allocation2] sm:$0x1] %v12_v0 }
   0x3   :  { %14 = vsyncpa [#allocation4], 0 }
   0x4   :  { %15 = vsyncpa [#allocation5], 0 }
   0x5   :  { %17 = vsyncpa [#allocation5 + $0x1], 0  ;;  %s1816_s26 = smov 0   ;;  %s1818_s27 = smov 0  }
   0x6   :  { %s1820_s28 = smov 0   ;;  %s1822_s29 = smov 0  }
   0x7 LB: > { %s1837_s6 = sadd.s32 4294967295, %s1767_s29   ;;  %s1330_s30 = sadd.s32 4294967294, %s1767_s29   ;;  %s1767_s29 = sphi %s1822_s29, %s2124_s29   ;;  %s1763_s28 = sphi %s1820_s28, %s2123_s28   ;;  %s1759_s27 = sphi %s1818_s27, %s2122_s27   ;;  %s1755_s26 = sphi %s1816_s26, %s2121_s26  }
   0x8   : > { %s1841_s8 = sadd.s32 1, %s1767_s29   ;;  %s182_s9 = sadd.s32 1, %s1763_s28 }
   0x9   : > { %s179_s10 = ssub.s32 %s1767_s29, %s1841_s8  ;;  %p192_p0 = scmp.ne.s32.totalorder %s1763_s28, %s1759_s27 }
   0xa   : > { %p180_p1 = scmp.eq.s32.totalorder %s179_s10, 0  ;;  %p193_p2 = scmp.eq.s32.totalorder %s1837_s6, 2 }
   0xb   : > { %p198_p3 = scmp.ne.s32.totalorder %s1759_s27, %s1755_s26  ;;  %p199_p4 = scmp.eq.s32.totalorder %s1330_s30, 2 }
   0xc   : > { %s1852_s11 = scalar_select %p180_p1, %s1763_s28, %s182_s9  }
   0xd   : > { %p1854_p5 = por %p193_p2, %p192_p0  ;;  %p1858_p6 = por %p199_p4, %p198_p3 }
   0xe   : > { %p1331_p7 = scmp.ge.s32.totalorder %s1767_s29, 1  ;;  %p206_p8 = scmp.lt.s32.totalorder %s1767_s29, 4 }
   0xf   : > { %p1626_p9 = scmp.eq.s32.totalorder %s1837_s6, 0  ;;  %s223_s16 = sshll.u32 %s2114_s3, 4  ;;  %s224_s16 = int_to_ptr.hbm [resolvable:$true] %s223_s16 }
  0x10   : > { %p207_p10 = pnand %p1331_p7, %p206_p8  ;;  %s1769_s17 = smov [#allocation3]  }
  0x11   : > { %s225_s18 = sshll.u32 %s1769_s17, 4  ;;  %s1770_s19 = smov 64   ;;  %s226_s18 = int_to_ptr.vmem [resolvable:$true] %s225_s18 }
  0x12   : > { %p1618_p11 = pneg %p207_p10  ;;  %s1771_s20 = smov 4  }
  0x13   : > { %259 = sbr.rel (%p207_p10) target bundleno = 667 (0x29b), region = 48 }
  0x14   : > { %p1619_p12 = pnand %p1626_p9, %p1618_p11 }
  0x16   : > { %1621 = dma.hbm_to_vmem [thread:$0]  (!%p1619_p12), %s224_s16, 4096, %s226_s18, [#allocation4], %s1770_s19, %s1770_s19, %s1771_s20  }
  0x18   : > { %1746 = dma.done.wait (%p1626_p9), [#allocation4], 4096  }
  0x19   : > { %1748 = vsyncadd (%p1626_p9), [#allocation4], 4294963200  ;;  %s1336_s21 = sshll.u32 %s1837_s6, 4  ;;  %v1388_v1 = vld [vmem:[%s2112_s1 + $0x20] sm:$0xf]  ;;  %vm412_vm0 = vcmask 261120   ;;  %s1259_s24 = scalar_lea.hbm %s2118_s7, %s1837_s6 }
  0x1a   : > { %p292_p13 = scmp.lt.s32.totalorder %s1336_s21, 47  ;;  %v1578_v2 = vld [vmem:[%s2112_s1 + $0x2c] sm:$0xf0]  ;;  %v1576_v3 = vld [vmem:[%s2112_s1 + $0x24] sm:$0xf]  ;;  %v1603_v29 = vld [vmem:[#allocation3 + $0xb8] sm:$0xff] }
  0x1b   : > { %v1389_v4 = vor.u32 %v1578_v2, %v1388_v1  ;;  %v1390_v5 = vld [vmem:[%s2112_s1 + $0x30] sm:$0xf0]  ;;  %v1396_v6 = vld [vmem:[%s2112_s1 + $0x28] sm:$0xf]  ;;  %v1579_v7 = vld [vmem:[%s2112_s1 + $0x34] sm:$0xf0] }
  0x1c   : > { %s2126_s21 = smov (!%p292_p13, %s1336_s21), 47  ;;  %v1393_v8 = vor.u32 %v1576_v3, %v1390_v5  ;;  %v1397_v9 = vor.u32 %v1579_v7, %v1396_v6  ;;  %v1577_v10 = vld [vmem:[%s2112_s1 + $0x2c] sm:$0xf]  ;;  %v1398_v11 = vld [vmem:[%s2112_s1 + $0x38] sm:$0xf0]  ;;  %v1602_v34 = vld [vmem:[#allocation3 + $0xb0] sm:$0xff] }
  0x1d   : > { %s1337_s22 = sshll.u32 %s2126_s21, 2  ;;  %v1372_v12 = vld [vmem:[%s2112_s1] sm:$0xf]  ;;  %443 = vmatpush.bf16.msra.mxu0 %v1389_v4  ;;  %v1401_v13 = vor.u32 %v1577_v10, %v1398_v11  ;;  %v1574_v14 = vld [vmem:[%s2112_s1 + $0xc] sm:$0xf0]  ;;  %s1263_s9 = sshll.u32 %s1259_s24, 4  ;;  %s1264_s9 = int_to_ptr.hbm [resolvable:$true] %s1263_s9 }
  0x1e   : > { %v1572_v15 = vld [vmem:[%s2112_s1 + $0x4] sm:$0xf]  ;;  %v1374_v16 = vld [vmem:[%s2112_s1 + $0x10] sm:$0xf0]  ;;  %s1914_s20 = scalar_lea.vmem %s2111_s0, %s1337_s22  ;;  %492 = vmatpush.bf16.msra.mxu1 %v1393_v8  ;;  %541 = vmatpush.bf16.msra.mxu2 %v1397_v9  ;;  %v1373_v17 = vor.u32 %v1574_v14, %v1372_v12  ;;  %v1380_v19 = vld [vmem:[%s2112_s1 + $0x8] sm:$0xf] }
  0x1f   : > { %v1377_v18 = vor.u32 %v1572_v15, %v1374_v16  ;;  %v1575_v20 = vld [vmem:[%s2112_s1 + $0x14] sm:$0xf0]  ;;  %v1573_v21 = vld [vmem:[%s2112_s1 + $0xc] sm:$0xf]  ;;  %590 = vmatpush.bf16.msra.mxu3 %v1401_v13  ;;  %v1382_v23 = vld [vmem:[%s2112_s1 + $0x18] sm:$0xf0] }
  0x20   : > { %v1381_v22 = vor.u32 %v1575_v20, %v1380_v19  ;;  %v1385_v24 = vor.u32 %v1573_v21, %v1382_v23  ;;  %v1564_v25 = vld [vmem:[%s1914_s20] sm:$0xff]  ;;  %v1565_v26 = vld [vmem:[%s1914_s20 + $0x8] sm:$0xff]  ;;  %v1566_v27 = vld [vmem:[%s1914_s20 + $0x10] sm:$0xff]  ;;  %s1715_s6 = sshra.s32 %s1264_s9, 4  ;;  %s1721_s16 = scalar_lea.hbm %s2118_s7, 3  ;;  %s1716_s6 = int_to_ptr.hbm [resolvable:$true] %s1715_s6 }
  0x21   : > { %444 = vmatpush.bf16.msra.mxu0 %v1373_v17  ;;  %v1567_v28 = vld [vmem:[%s1914_s20 + $0x18] sm:$0xff]  ;;  %v1568_v33 = vld [vmem:[%s1914_s20 + $0x20] sm:$0xff]  ;;  %v1569_v38 = vld [vmem:[%s1914_s20 + $0x28] sm:$0xff]  ;;  %s1717_s10 = scalar_lea.hbm %s1716_s6, 1  ;;  %p1722_p3 = scmp.lt.s32.totalorder %s1716_s6, %s2118_s7 }
  0x22   : > { %493 = vmatpush.bf16.msra.mxu1 %v1377_v18  ;;  %542 = vmatpush.bf16.msra.mxu2 %v1381_v22  ;;  %v1587_v30 = vld [vmem:[#allocation3 + $0x38] sm:$0xff]  ;;  %v1586_v35 = vld [vmem:[#allocation3 + $0x30] sm:$0xff]  ;;  %v1601_v39 = vld [vmem:[#allocation3 + $0xa8] sm:$0xff]  ;;  %p1718_p0 = scmp.ne.s32.totalorder %s1716_s6, %s1717_s10  ;;  %p1723_p4 = scmp.lt.s32.totalorder %s1721_s16, %s1717_s10 }
  0x23   : > { %591 = vmatpush.bf16.msra.mxu3 %v1385_v24  ;;  %v1611_v31 = vld [vmem:[#allocation3 + $0xf8] sm:$0xff]  ;;  %v1610_v36 = vld [vmem:[#allocation3 + $0xf0] sm:$0xff]  ;;  %v1585_v40 = vld [vmem:[#allocation3 + $0x28] sm:$0xff] }
  0x24   : > { %1402 = vmatmul.msk.bf16.vlgmr.msra.gmra.mxu0 %vm412_vm0, %v1564_v25  ;;  %v1595_v32 = vld [vmem:[#allocation3 + $0x78] sm:$0xff]  ;;  %v1594_v37 = vld [vmem:[#allocation3 + $0x70] sm:$0xff]  ;;  %v1593_v41 = vld [vmem:[#allocation3 + $0x68] sm:$0xff]  ;;  %p1719_p1 = pnand %p1718_p0, %p1854_p5  ;;  %p1724_p7 = por %p1723_p4, %p1722_p3 }
  0x25   : > { %1410 = vmatmul.msk.bf16.vlgmr.msra.gmra.mxu1 %vm412_vm0, %v1564_v25  ;;  %1418 = vmatmul.msk.bf16.vlgmr.msra.gmra.mxu2 %vm412_vm0, %v1564_v25  ;;  %v1609_v42 = vld [vmem:[#allocation3 + $0xe8] sm:$0xff]  ;;  %v1584_v43 = vld [vmem:[#allocation3 + $0x20] sm:$0xff]  ;;  %v1583_v46 = vld [vmem:[#allocation3 + $0x18] sm:$0xff] }
  0x26   : > { %1426 = vmatmul.msk.bf16.vlgmr.msra.gmra.mxu3 %vm412_vm0, %v1564_v25  ;;  %1087 = vmatpush.bf16.msrb.mxu2 %v1603_v29  ;;  %v1592_v44 = vld [vmem:[#allocation3 + $0x60] sm:$0xff]  ;;  %v1570_v45 = vld [vmem:[%s1914_s20 + $0x30] sm:$0xff]  ;;  %v1591_v47 = vld [vmem:[#allocation3 + $0x58] sm:$0xff]  ;;  %p1720_p2 = pneg %p1719_p1 }
  0x27   : > { %989 = vmatpush.bf16.msrb.mxu0 %v1587_v30  ;;  %1136 = vmatpush.bf16.msrb.mxu3 %v1611_v31  ;;  %v1600_v48 = vld [vmem:[#allocation3 + $0xa0] sm:$0xff]  ;;  %v1582_v50 = vld [vmem:[#allocation3 + $0x10] sm:$0xff]  ;;  %v1599_v52 = vld [vmem:[#allocation3 + $0x98] sm:$0xff] }
  0x28   : > { %1038 = vmatpush.bf16.msrb.mxu1 %v1595_v32  ;;  %v1608_v49 = vld [vmem:[#allocation3 + $0xe0] sm:$0xff]  ;;  %v1590_v51 = vld [vmem:[#allocation3 + $0x50] sm:$0xff]  ;;  %v1607_v53 = vld [vmem:[#allocation3 + $0xd8] sm:$0xff]  ;;  %p1725_p8 = pnand %p1724_p7, %p1720_p2 }
  0x29   : > { %v1581_v54 = vld [vmem:[#allocation3 + $0x8] sm:$0xff]  ;;  %v1598_v56 = vld [vmem:[#allocation3 + $0x90] sm:$0xff]  ;;  %v1580_v58 = vld [vmem:[#allocation3] sm:$0xff] }
  0x2a   : > { %1088 = vmatpush.bf16.msrb.mxu2 %v1602_v34  ;;  %v1589_v55 = vld [vmem:[#allocation3 + $0x48] sm:$0xff]  ;;  %v1606_v57 = vld [vmem:[#allocation3 + $0xd0] sm:$0xff]  ;;  %v1588_v59 = vld [vmem:[#allocation3 + $0x40] sm:$0xff] }
  0x2b   : > { %990 = vmatpush.bf16.msrb.mxu0 %v1586_v35  ;;  %1137 = vmatpush.bf16.msrb.mxu3 %v1610_v36  ;;  %v1597_v60 = vld [vmem:[#allocation3 + $0x88] sm:$0xff]  ;;  %v1571_v62 = vld [vmem:[%s1914_s20 + $0x38] sm:$0xff]  ;;  %v1596_v63 = vld [vmem:[#allocation3 + $0x80] sm:$0xff]  ;;  %s289_s20 = sand.u32 1, %s1759_s27  }
  0x2c   : > { %1039 = vmatpush.bf16.msrb.mxu1 %v1594_v37  ;;  %v1605_v61 = vld [vmem:[#allocation3 + $0xc8] sm:$0xff]  ;;  %v1604_v0 = vld [vmem:[#allocation3 + $0xc0] sm:$0xff]  ;;  %s290_s25 = scalar_lea.vmem [#allocation6], %s289_s20  ;;  %s1251_s22 = scalar_lea.sflag [#allocation5], %s289_s20 }
  0x2d   : > { %v322_v1 = vld [vmem:[%s2113_s2] sm:$0xf]  ;;  %s1261_s30 = sshll.u32 %s290_s25, 4  ;;  %s1262_s30 = int_to_ptr.vmem [resolvable:$true] %s1261_s30 }
  0x2e   : > { %1089 = vmatpush.bf16.msrb.mxu2 %v1601_v39  ;;  %v1971_v3 = vperm.slane %v322_v1, 0  ;;  %v1973_v5 = vperm.slane %v322_v1, 1  ;;  %v1978_v15 = vperm.slane %v322_v1, 2  ;;  %v1981_v17 = vperm.slane %v322_v1, 3 }
  0x2f   : > { %991 = vmatpush.bf16.msrb.mxu0 %v1585_v40  ;;  %1138 = vmatpush.bf16.msrb.mxu3 %v1609_v42 }
  0x30   : > { %1040 = vmatpush.bf16.msrb.mxu1 %v1593_v41 }
  0x32   : > { %1090 = vmatpush.bf16.msrb.mxu2 %v1600_v48 }
  0x33   : > { %992 = vmatpush.bf16.msrb.mxu0 %v1584_v43  ;;  %1139 = vmatpush.bf16.msrb.mxu3 %v1608_v49 }
  0x34   : > { %1403 = vmatmul.msk.bf16.gmra.mxu0 %vm412_vm0, %v1565_v26  ;;  %1041 = vmatpush.bf16.msrb.mxu1 %v1592_v44 }
  0x35   : > { %1411 = vmatmul.msk.bf16.gmra.mxu1 %vm412_vm0, %v1565_v26  ;;  %1419 = vmatmul.msk.bf16.gmra.mxu2 %vm412_vm0, %v1565_v26 }
  0x36   : > { %1427 = vmatmul.msk.bf16.gmra.mxu3 %vm412_vm0, %v1565_v26  ;;  %1091 = vmatpush.bf16.msrb.mxu2 %v1599_v52 }
  0x37   : > { %993 = vmatpush.bf16.msrb.mxu0 %v1583_v46  ;;  %1140 = vmatpush.bf16.msrb.mxu3 %v1607_v53 }
  0x38   : > { %1042 = vmatpush.bf16.msrb.mxu1 %v1591_v47 }
  0x3a   : > { %1092 = vmatpush.bf16.msrb.mxu2 %v1598_v56 }
  0x3b   : > { %994 = vmatpush.bf16.msrb.mxu0 %v1582_v50  ;;  %1141 = vmatpush.bf16.msrb.mxu3 %v1606_v57 }
  0x3c   : > { %1043 = vmatpush.bf16.msrb.mxu1 %v1590_v51 }
  0x3e   : > { %1093 = vmatpush.bf16.msrb.mxu2 %v1597_v60 }
  0x3f   : > { %995 = vmatpush.bf16.msrb.mxu0 %v1581_v54  ;;  %1142 = vmatpush.bf16.msrb.mxu3 %v1605_v61 }
  0x40   : > { %1044 = vmatpush.bf16.msrb.mxu1 %v1589_v55 }
  0x42   : > { %1094 = vmatpush.bf16.msrb.mxu2 %v1596_v63 }
  0x43   : > { %996 = vmatpush.bf16.msrb.mxu0 %v1580_v58  ;;  %1143 = vmatpush.bf16.msrb.mxu3 %v1604_v0 }
  0x44   : > { %1404 = vmatmul.msk.bf16.gmra.mxu0 %vm412_vm0, %v1566_v27  ;;  %1045 = vmatpush.bf16.msrb.mxu1 %v1588_v59 }
  0x45   : > { %1412 = vmatmul.msk.bf16.gmra.mxu1 %vm412_vm0, %v1566_v27  ;;  %1420 = vmatmul.msk.bf16.gmra.mxu2 %vm412_vm0, %v1566_v27 }
  0x46   : > { %1428 = vmatmul.msk.bf16.gmra.mxu3 %vm412_vm0, %v1566_v27 }
  0x54   : > { %1405 = vmatmul.msk.bf16.gmra.mxu0 %vm412_vm0, %v1567_v28 }
  0x55   : > { %1413 = vmatmul.msk.bf16.gmra.mxu1 %vm412_vm0, %v1567_v28  ;;  %1421 = vmatmul.msk.bf16.gmra.mxu2 %vm412_vm0, %v1567_v28 }
  0x56   : > { %1429 = vmatmul.msk.bf16.gmra.mxu3 %vm412_vm0, %v1567_v28 }
  0x64   : > { %1406 = vmatmul.msk.bf16.gmra.mxu0 %vm412_vm0, %v1568_v33 }
  0x65   : > { %1414 = vmatmul.msk.bf16.gmra.mxu1 %vm412_vm0, %v1568_v33  ;;  %1422 = vmatmul.msk.bf16.gmra.mxu2 %vm412_vm0, %v1568_v33 }
  0x66   : > { %1430 = vmatmul.msk.bf16.gmra.mxu3 %vm412_vm0, %v1568_v33 }
  0x74   : > { %1407 = vmatmul.msk.bf16.gmra.mxu0 %vm412_vm0, %v1569_v38 }
  0x75   : > { %1415 = vmatmul.msk.bf16.gmra.mxu1 %vm412_vm0, %v1569_v38  ;;  %1423 = vmatmul.msk.bf16.gmra.mxu2 %vm412_vm0, %v1569_v38 }
  0x76   : > { %1431 = vmatmul.msk.bf16.gmra.mxu3 %vm412_vm0, %v1569_v38 }
  0x84   : > { %1408 = vmatmul.msk.bf16.gmra.mxu0 %vm412_vm0, %v1570_v45 }
  0x85   : > { %1416 = vmatmul.msk.bf16.gmra.mxu1 %vm412_vm0, %v1570_v45  ;;  %1424 = vmatmul.msk.bf16.gmra.mxu2 %vm412_vm0, %v1570_v45 }
  0x86   : > { %1432 = vmatmul.msk.bf16.gmra.mxu3 %vm412_vm0, %v1570_v45 }
  0x94   : > { %1409 = vmatmul.msk.bf16.gmra.mxu0 %vm412_vm0, %v1571_v62 }
  0x95   : > { %1417 = vmatmul.msk.bf16.gmra.mxu1 %vm412_vm0, %v1571_v62  ;;  %1425 = vmatmul.msk.bf16.gmra.mxu2 %vm412_vm0, %v1571_v62 }
  0x96   : > { %1433 = vmatmul.msk.bf16.gmra.mxu3 %vm412_vm0, %v1571_v62 }
  0xa1   : > { %v446_v2 = vpop.f32.mrf.mxu0 }
  0xa2   : > { %v495_v4 = vpop.f32.mrf.mxu1  ;;  %v447_v6 = vadd.f32 %v446_v2, %v1971_v3 }
  0xa3   : > { %v496_v7 = vadd.f32 %v495_v4, %v1973_v5 }
  0xa4   : > { %v633_v11 = vmax.f32 %v447_v6, 0.0 }
  0xa5   : > { %v634_v14 = vmax.f32 %v496_v7, 0.0 }
  0xa8   : > { %v544_v8 = vpop.f32.mrf.mxu2 }
  0xa9   : > { %v593_v9 = vpop.f32.mrf.mxu3  ;;  %v448_v10 = vpop.f32.mrf.mxu0  ;;  %v545_v21 = vadd.f32 %v544_v8, %v1978_v15 }
  0xaa   : > { %v449_v12 = vadd.f32 %v448_v10, %v1971_v3  ;;  %v497_v13 = vpop.f32.mrf.mxu1  ;;  %v594_v23 = vadd.f32 %v593_v9, %v1981_v17 }
  0xab   : > { %v498_v16 = vadd.f32 %v497_v13, %v1973_v5  ;;  %v635_v30 = vmax.f32 %v545_v21, 0.0 }
  0xac   : > { %v637_v18 = vmax.f32 %v449_v12, 0.0  ;;  %v636_v32 = vmax.f32 %v594_v23, 0.0 }
  0xad   : > { %v638_v19 = vmax.f32 %v498_v16, 0.0 }
  0xae   : > { %v697_v20 = vpack.c.bf16 %v637_v18, %v633_v11 }
  0xaf   : > { %v698_v22 = vpack.c.bf16 %v638_v19, %v634_v14 }
  0xb0   : > { %v546_v24 = vpop.f32.mrf.mxu2  ;;  %997 = vmatmul.bf16.vlgmr.msrb.gmra.mxu0 %v697_v20 }
  0xb1   : > { %v547_v25 = vadd.f32 %v546_v24, %v1978_v15  ;;  %v595_v26 = vpop.f32.mrf.mxu3  ;;  %1046 = vmatmul.bf16.vlgmr.msrb.gmra.mxu1 %v698_v22  ;;  %v451_v27 = vpop.f32.mrf.mxu0 }
  0xb2   : > { %v596_v28 = vadd.f32 %v595_v26, %v1981_v17  ;;  %v500_v29 = vpop.f32.mrf.mxu1  ;;  %v452_v35 = vadd.f32 %v451_v27, %v1971_v3 }
  0xb3   : > { %v639_v31 = vmax.f32 %v547_v25, 0.0  ;;  %v501_v37 = vadd.f32 %v500_v29, %v1973_v5 }
  0xb4   : > { %v640_v33 = vmax.f32 %v596_v28, 0.0  ;;  %v641_v41 = vmax.f32 %v452_v35, 0.0 }
  0xb5   : > { %v699_v34 = vpack.c.bf16 %v639_v31, %v635_v30  ;;  %v642_v44 = vmax.f32 %v501_v37, 0.0 }
  0xb6   : > { %v700_v36 = vpack.c.bf16 %v640_v33, %v636_v32 }
  0xb7   : > { %1095 = vmatmul.bf16.vlgmr.msrb.gmra.mxu2 %v699_v34 }
  0xb8   : > { %1144 = vmatmul.bf16.vlgmr.msrb.gmra.mxu3 %v700_v36  ;;  %v549_v38 = vpop.f32.mrf.mxu2 }
  0xb9   : > { %v598_v39 = vpop.f32.mrf.mxu3  ;;  %v453_v40 = vpop.f32.mrf.mxu0  ;;  %v550_v49 = vadd.f32 %v549_v38, %v1978_v15 }
  0xba   : > { %v454_v42 = vadd.f32 %v453_v40, %v1971_v3  ;;  %v502_v43 = vpop.f32.mrf.mxu1  ;;  %v599_v51 = vadd.f32 %v598_v39, %v1981_v17 }
  0xbb   : > { %v503_v45 = vadd.f32 %v502_v43, %v1973_v5  ;;  %v643_v58 = vmax.f32 %v550_v49, 0.0 }
  0xbc   : > { %v645_v46 = vmax.f32 %v454_v42, 0.0  ;;  %v644_v60 = vmax.f32 %v599_v51, 0.0 }
  0xbd   : > { %v646_v47 = vmax.f32 %v503_v45, 0.0 }
  0xbe   : > { %v701_v48 = vpack.c.bf16 %v645_v46, %v641_v41 }
  0xbf   : > { %v702_v50 = vpack.c.bf16 %v646_v47, %v642_v44 }
  0xc0   : > { %v551_v52 = vpop.f32.mrf.mxu2  ;;  %1002 = vmatmul.bf16.gmra.mxu0 %v701_v48 }
  0xc1   : > { %v552_v53 = vadd.f32 %v551_v52, %v1978_v15  ;;  %v600_v54 = vpop.f32.mrf.mxu3  ;;  %1051 = vmatmul.bf16.gmra.mxu1 %v702_v50  ;;  %v456_v55 = vpop.f32.mrf.mxu0 }
  0xc2   : > { %v601_v56 = vadd.f32 %v600_v54, %v1981_v17  ;;  %v505_v57 = vpop.f32.mrf.mxu1  ;;  %v457_v63 = vadd.f32 %v456_v55, %v1971_v3 }
  0xc3   : > { %v647_v59 = vmax.f32 %v552_v53, 0.0  ;;  %v506_v1 = vadd.f32 %v505_v57, %v1973_v5 }
  0xc4   : > { %v648_v61 = vmax.f32 %v601_v56, 0.0  ;;  %v649_v7 = vmax.f32 %v457_v63, 0.0 }
  0xc5   : > { %v703_v62 = vpack.c.bf16 %v647_v59, %v643_v58  ;;  %v650_v10 = vmax.f32 %v506_v1, 0.0 }
  0xc6   : > { %v704_v0 = vpack.c.bf16 %v648_v61, %v644_v60 }
  0xc7   : > { %1100 = vmatmul.bf16.gmra.mxu2 %v703_v62 }
  0xc8   : > { %1149 = vmatmul.bf16.gmra.mxu3 %v704_v0  ;;  %v554_v2 = vpop.f32.mrf.mxu2 }
  0xc9   : > { %v603_v4 = vpop.f32.mrf.mxu3  ;;  %v458_v6 = vpop.f32.mrf.mxu0  ;;  %v555_v16 = vadd.f32 %v554_v2, %v1978_v15 }
  0xca   : > { %v459_v8 = vadd.f32 %v458_v6, %v1971_v3  ;;  %v507_v9 = vpop.f32.mrf.mxu1  ;;  %v604_v19 = vadd.f32 %v603_v4, %v1981_v17 }
  0xcb   : > { %v508_v11 = vadd.f32 %v507_v9, %v1973_v5  ;;  %v651_v26 = vmax.f32 %v555_v16, 0.0 }
  0xcc   : > { %v653_v12 = vmax.f32 %v459_v8, 0.0  ;;  %v652_v28 = vmax.f32 %v604_v19, 0.0 }
  0xcd   : > { %v654_v13 = vmax.f32 %v508_v11, 0.0 }
  0xce   : > { %v705_v14 = vpack.c.bf16 %v653_v12, %v649_v7 }
  0xcf   : > { %v706_v18 = vpack.c.bf16 %v654_v13, %v650_v10 }
  0xd0   : > { %v556_v20 = vpop.f32.mrf.mxu2  ;;  %1007 = vmatmul.bf16.gmra.mxu0 %v705_v14 }
  0xd1   : > { %v557_v21 = vadd.f32 %v556_v20, %v1978_v15  ;;  %v605_v22 = vpop.f32.mrf.mxu3  ;;  %1056 = vmatmul.bf16.gmra.mxu1 %v706_v18  ;;  %v461_v23 = vpop.f32.mrf.mxu0 }
  0xd2   : > { %v606_v24 = vadd.f32 %v605_v22, %v1981_v17  ;;  %v510_v25 = vpop.f32.mrf.mxu1  ;;  %v462_v31 = vadd.f32 %v461_v23, %v1971_v3 }
  0xd3   : > { %v655_v27 = vmax.f32 %v557_v21, 0.0  ;;  %v511_v33 = vadd.f32 %v510_v25, %v1973_v5 }
  0xd4   : > { %v656_v29 = vmax.f32 %v606_v24, 0.0  ;;  %v657_v37 = vmax.f32 %v462_v31, 0.0 }
  0xd5   : > { %v707_v30 = vpack.c.bf16 %v655_v27, %v651_v26  ;;  %v658_v40 = vmax.f32 %v511_v33, 0.0 }
  0xd6   : > { %v708_v32 = vpack.c.bf16 %v656_v29, %v652_v28 }
  0xd7   : > { %1105 = vmatmul.bf16.gmra.mxu2 %v707_v30 }
  0xd8   : > { %1154 = vmatmul.bf16.gmra.mxu3 %v708_v32  ;;  %v559_v34 = vpop.f32.mrf.mxu2 }
  0xd9   : > { %v608_v35 = vpop.f32.mrf.mxu3  ;;  %v463_v36 = vpop.f32.mrf.mxu0  ;;  %v560_v45 = vadd.f32 %v559_v34, %v1978_v15 }
  0xda   : > { %v464_v38 = vadd.f32 %v463_v36, %v1971_v3  ;;  %v512_v39 = vpop.f32.mrf.mxu1  ;;  %v609_v47 = vadd.f32 %v608_v35, %v1981_v17 }
  0xdb   : > { %v513_v41 = vadd.f32 %v512_v39, %v1973_v5  ;;  %v659_v54 = vmax.f32 %v560_v45, 0.0 }
  0xdc   : > { %v661_v42 = vmax.f32 %v464_v38, 0.0  ;;  %v660_v56 = vmax.f32 %v609_v47, 0.0 }
  0xdd   : > { %v662_v43 = vmax.f32 %v513_v41, 0.0 }
  0xde   : > { %v709_v44 = vpack.c.bf16 %v661_v42, %v657_v37 }
  0xdf   : > { %v710_v46 = vpack.c.bf16 %v662_v43, %v658_v40 }
  0xe0   : > { %v561_v48 = vpop.f32.mrf.mxu2  ;;  %1012 = vmatmul.bf16.gmra.mxu0 %v709_v44 }
  0xe1   : > { %v562_v49 = vadd.f32 %v561_v48, %v1978_v15  ;;  %v610_v50 = vpop.f32.mrf.mxu3  ;;  %1061 = vmatmul.bf16.gmra.mxu1 %v710_v46  ;;  %v466_v51 = vpop.f32.mrf.mxu0 }
  0xe2   : > { %v611_v52 = vadd.f32 %v610_v50, %v1981_v17  ;;  %v515_v53 = vpop.f32.mrf.mxu1  ;;  %v467_v59 = vadd.f32 %v466_v51, %v1971_v3 }
  0xe3   : > { %v663_v55 = vmax.f32 %v562_v49, 0.0  ;;  %v516_v61 = vadd.f32 %v515_v53, %v1973_v5 }
  0xe4   : > { %v664_v57 = vmax.f32 %v611_v52, 0.0  ;;  %v665_v1 = vmax.f32 %v467_v59, 0.0 }
  0xe5   : > { %v711_v58 = vpack.c.bf16 %v663_v55, %v659_v54  ;;  %v666_v6 = vmax.f32 %v516_v61, 0.0 }
  0xe6   : > { %v712_v60 = vpack.c.bf16 %v664_v57, %v660_v56 }
  0xe7   : > { %1110 = vmatmul.bf16.gmra.mxu2 %v711_v58 }
  0xe8   : > { %1159 = vmatmul.bf16.gmra.mxu3 %v712_v60  ;;  %v564_v62 = vpop.f32.mrf.mxu2 }
  0xe9   : > { %v613_v63 = vpop.f32.mrf.mxu3  ;;  %v468_v0 = vpop.f32.mrf.mxu0  ;;  %v565_v11 = vadd.f32 %v564_v62, %v1978_v15 }
  0xea   : > { %v469_v2 = vadd.f32 %v468_v0, %v1971_v3  ;;  %v517_v4 = vpop.f32.mrf.mxu1  ;;  %v614_v13 = vadd.f32 %v613_v63, %v1981_v17 }
  0xeb   : > { %v518_v7 = vadd.f32 %v517_v4, %v1973_v5  ;;  %v667_v22 = vmax.f32 %v565_v11, 0.0 }
  0xec   : > { %v669_v8 = vmax.f32 %v469_v2, 0.0  ;;  %v668_v24 = vmax.f32 %v614_v13, 0.0 }
  0xed   : > { %v670_v9 = vmax.f32 %v518_v7, 0.0 }
  0xee   : > { %v713_v10 = vpack.c.bf16 %v669_v8, %v665_v1 }
  0xef   : > { %v714_v12 = vpack.c.bf16 %v670_v9, %v666_v6 }
  0xf0   : > { %v566_v14 = vpop.f32.mrf.mxu2  ;;  %1017 = vmatmul.bf16.gmra.mxu0 %v713_v10 }
  0xf1   : > { %v567_v16 = vadd.f32 %v566_v14, %v1978_v15  ;;  %v615_v18 = vpop.f32.mrf.mxu3  ;;  %1066 = vmatmul.bf16.gmra.mxu1 %v714_v12  ;;  %v471_v19 = vpop.f32.mrf.mxu0 }
  0xf2   : > { %v616_v20 = vadd.f32 %v615_v18, %v1981_v17  ;;  %v520_v21 = vpop.f32.mrf.mxu1  ;;  %v472_v28 = vadd.f32 %v471_v19, %v1971_v3 }
  0xf3   : > { %v671_v23 = vmax.f32 %v567_v16, 0.0  ;;  %v521_v29 = vadd.f32 %v520_v21, %v1973_v5 }
  0xf4   : > { %v672_v25 = vmax.f32 %v616_v20, 0.0  ;;  %v673_v33 = vmax.f32 %v472_v28, 0.0 }
  0xf5   : > { %v715_v26 = vpack.c.bf16 %v671_v23, %v667_v22  ;;  %v674_v36 = vmax.f32 %v521_v29, 0.0 }
  0xf6   : > { %v716_v27 = vpack.c.bf16 %v672_v25, %v668_v24 }
  0xf7   : > { %1115 = vmatmul.bf16.gmra.mxu2 %v715_v26 }
  0xf8   : > { %1164 = vmatmul.bf16.gmra.mxu3 %v716_v27  ;;  %v569_v30 = vpop.f32.mrf.mxu2 }
  0xf9   : > { %v618_v31 = vpop.f32.mrf.mxu3  ;;  %v473_v32 = vpop.f32.mrf.mxu0  ;;  %v570_v41 = vadd.f32 %v569_v30, %v1978_v15 }
  0xfa   : > { %v474_v34 = vadd.f32 %v473_v32, %v1971_v3  ;;  %v522_v35 = vpop.f32.mrf.mxu1  ;;  %v619_v43 = vadd.f32 %v618_v31, %v1981_v17 }
  0xfb   : > { %v523_v37 = vadd.f32 %v522_v35, %v1973_v5  ;;  %v675_v50 = vmax.f32 %v570_v41, 0.0 }
  0xfc   : > { %v677_v38 = vmax.f32 %v474_v34, 0.0  ;;  %v676_v52 = vmax.f32 %v619_v43, 0.0 }
  0xfd   : > { %v678_v39 = vmax.f32 %v523_v37, 0.0 }
  0xfe   : > { %v717_v40 = vpack.c.bf16 %v677_v38, %v673_v33 }
  0xff   : > { %v718_v42 = vpack.c.bf16 %v678_v39, %v674_v36 }
 0x100   : > { %v571_v44 = vpop.f32.mrf.mxu2  ;;  %1022 = vmatmul.bf16.gmra.mxu0 %v717_v40 }
 0x101   : > { %v572_v45 = vadd.f32 %v571_v44, %v1978_v15  ;;  %v620_v46 = vpop.f32.mrf.mxu3  ;;  %1071 = vmatmul.bf16.gmra.mxu1 %v718_v42  ;;  %v476_v47 = vpop.f32.mrf.mxu0 }
 0x102   : > { %v621_v48 = vadd.f32 %v620_v46, %v1981_v17  ;;  %v525_v49 = vpop.f32.mrf.mxu1  ;;  %v477_v56 = vadd.f32 %v476_v47, %v1971_v3 }
 0x103   : > { %v679_v51 = vmax.f32 %v572_v45, 0.0  ;;  %v526_v57 = vadd.f32 %v525_v49, %v1973_v5 }
 0x104   : > { %v680_v53 = vmax.f32 %v621_v48, 0.0  ;;  %v681_v61 = vmax.f32 %v477_v56, 0.0  ;;  %v2046_v48 = vld [vmem:[%s2115_s4] ss:$0 sm:$0xff] }
 0x105   : > { %v719_v54 = vpack.c.bf16 %v679_v51, %v675_v50  ;;  %v682_v0 = vmax.f32 %v526_v57, 0.0 }
 0x106   : > { %v720_v55 = vpack.c.bf16 %v680_v53, %v676_v52 }
 0x107   : > { %1120 = vmatmul.bf16.gmra.mxu2 %v719_v54 }
 0x108   : > { %1169 = vmatmul.bf16.gmra.mxu3 %v720_v55  ;;  %v574_v58 = vpop.f32.mrf.mxu2 }
 0x109   : > { %v623_v59 = vpop.f32.mrf.mxu3  ;;  %v478_v60 = vpop.f32.mrf.mxu0  ;;  %v575_v7 = vadd.f32 %v574_v58, %v1978_v15 }
 0x10a   : > { %v479_v62 = vadd.f32 %v478_v60, %v1971_v3  ;;  %v527_v63 = vpop.f32.mrf.mxu1  ;;  %v624_v9 = vadd.f32 %v623_v59, %v1981_v17 }
 0x10b   : > { %v528_v1 = vadd.f32 %v527_v63, %v1973_v5  ;;  %v683_v18 = vmax.f32 %v575_v7, 0.0 }
 0x10c   : > { %v685_v2 = vmax.f32 %v479_v62, 0.0  ;;  %v684_v20 = vmax.f32 %v624_v9, 0.0 }
 0x10d   : > { %v686_v4 = vmax.f32 %v528_v1, 0.0 }
 0x10e   : > { %v721_v6 = vpack.c.bf16 %v685_v2, %v681_v61 }
 0x10f   : > { %v722_v8 = vpack.c.bf16 %v686_v4, %v682_v0 }
 0x110   : > { %v576_v10 = vpop.f32.mrf.mxu2  ;;  %1027 = vmatmul.bf16.gmra.mxu0 %v721_v6 }
 0x111   : > { %v577_v11 = vadd.f32 %v576_v10, %v1978_v15  ;;  %v625_v12 = vpop.f32.mrf.mxu3  ;;  %1076 = vmatmul.bf16.gmra.mxu1 %v722_v8  ;;  %v481_v13 = vpop.f32.mrf.mxu0 }
 0x112   : > { %v626_v14 = vadd.f32 %v625_v12, %v1981_v17  ;;  %v530_v16 = vpop.f32.mrf.mxu1  ;;  %v482_v24 = vadd.f32 %v481_v13, %v1971_v3 }
 0x113   : > { %v687_v19 = vmax.f32 %v577_v11, 0.0  ;;  %v531_v25 = vadd.f32 %v530_v16, %v1973_v5 }
 0x114   : > { %v688_v21 = vmax.f32 %v626_v14, 0.0  ;;  %v689_v29 = vmax.f32 %v482_v24, 0.0 }
 0x115   : > { %v723_v22 = vpack.c.bf16 %v687_v19, %v683_v18  ;;  %v690_v32 = vmax.f32 %v531_v25, 0.0 }
 0x116   : > { %v724_v23 = vpack.c.bf16 %v688_v21, %v684_v20 }
 0x117   : > { %1125 = vmatmul.bf16.gmra.mxu2 %v723_v22 }
 0x118   : > { %1174 = vmatmul.bf16.gmra.mxu3 %v724_v23  ;;  %v579_v26 = vpop.f32.mrf.mxu2 }
 0x119   : > { %v628_v27 = vpop.f32.mrf.mxu3  ;;  %v483_v28 = vpop.f32.mrf.mxu0  ;;  %v580_v37 = vadd.f32 %v579_v26, %v1978_v15 }
 0x11a   : > { %v484_v30 = vadd.f32 %v483_v28, %v1971_v3  ;;  %v532_v31 = vpop.f32.mrf.mxu1  ;;  %v629_v39 = vadd.f32 %v628_v27, %v1981_v17 }
 0x11b   : > { %v533_v33 = vadd.f32 %v532_v31, %v1973_v5  ;;  %v691_v43 = vmax.f32 %v580_v37, 0.0 }
 0x11c   : > { %v693_v34 = vmax.f32 %v484_v30, 0.0  ;;  %v692_v45 = vmax.f32 %v629_v39, 0.0 }
 0x11d   : > { %v694_v35 = vmax.f32 %v533_v33, 0.0 }
 0x11e   : > { %v725_v36 = vpack.c.bf16 %v693_v34, %v689_v29 }
 0x11f   : > { %v726_v38 = vpack.c.bf16 %v694_v35, %v690_v32 }
 0x120   : > { %v581_v40 = vpop.f32.mrf.mxu2  ;;  %1032 = vmatmul.bf16.gmra.mxu0 %v725_v36 }
 0x121   : > { %v582_v41 = vadd.f32 %v581_v40, %v1978_v15  ;;  %v630_v42 = vpop.f32.mrf.mxu3  ;;  %1081 = vmatmul.bf16.gmra.mxu1 %v726_v38 }
 0x122   : > { %v631_v3 = vadd.f32 %v630_v42, %v1981_v17 }
 0x123   : > { %v695_v44 = vmax.f32 %v582_v41, 0.0 }
 0x124   : > { %v696_v5 = vmax.f32 %v631_v3, 0.0 }
 0x125   : > { %v727_v46 = vpack.c.bf16 %v695_v44, %v691_v43 }
 0x126   : > { %v728_v47 = vpack.c.bf16 %v696_v5, %v692_v45 }
 0x127   : > { %1130 = vmatmul.bf16.gmra.mxu2 %v727_v46 }
 0x128   : > { %1179 = vmatmul.bf16.gmra.mxu3 %v728_v47 }
 0x12d   : > { %v998_v49 = vpop.f32.mrf.mxu0 }
 0x12e   : > { %v999_v15 = vadd.f32 %v2046_v48, %v998_v49  ;;  %v1047_v50 = vpop.f32.mrf.mxu1 }
 0x130   : > { %v1048_v51 = vadd.f32 %v1047_v50, %v999_v15 }
 0x135   : > { %v1000_v52 = vpop.f32.mrf.mxu0 }
 0x136   : > { %v1001_v17 = vadd.f32 %v2046_v48, %v1000_v52  ;;  %v1049_v53 = vpop.f32.mrf.mxu1 }
 0x138   : > { %v1050_v54 = vadd.f32 %v1049_v53, %v1001_v17 }
 0x13a   : > { %v1096_v55 = vpop.f32.mrf.mxu2 }
 0x13b   : > { %v1097_v56 = vadd.f32 %v1096_v55, %v1048_v51  ;;  %v1145_v57 = vpop.f32.mrf.mxu3 }
 0x13d   : > { %v1146_v58 = vadd.f32 %v1145_v57, %v1097_v56  ;;  %v1003_v59 = vpop.f32.mrf.mxu0 }
 0x13e   : > { %v1004_v60 = vadd.f32 %v2046_v48, %v1003_v59  ;;  %v1052_v61 = vpop.f32.mrf.mxu1 }
 0x13f   : > { %v1185_v8 = vmax.f32 %v1146_v58, 0.0 }
 0x140   : > { %v1053_v62 = vadd.f32 %v1052_v61, %v1004_v60 }
 0x142   : > { %v1098_v63 = vpop.f32.mrf.mxu2 }
 0x143   : > { %v1099_v0 = vadd.f32 %v1098_v63, %v1050_v54  ;;  %v1147_v1 = vpop.f32.mrf.mxu3 }
 0x145   : > { %v1148_v2 = vadd.f32 %v1147_v1, %v1099_v0  ;;  %v1005_v4 = vpop.f32.mrf.mxu0 }
 0x146   : > { %v1006_v6 = vadd.f32 %v2046_v48, %v1005_v4  ;;  %v1054_v7 = vpop.f32.mrf.mxu1 }
 0x147   : > { %v1186_v9 = vmax.f32 %v1148_v2, 0.0 }
 0x148   : > { %v1055_v10 = vadd.f32 %v1054_v7, %v1006_v6 }
 0x149   : > { %v2052_v11 = vpack.c.bf16 %v1186_v9, %v1185_v8 }
 0x14a   : > { %v1101_v12 = vpop.f32.mrf.mxu2 }
 0x14b   : > { %v1102_v13 = vadd.f32 %v1101_v12, %v1053_v62  ;;  %v1150_v14 = vpop.f32.mrf.mxu3 }
 0x14d   : > { %v1151_v16 = vadd.f32 %v1150_v14, %v1102_v13  ;;  %v1008_v18 = vpop.f32.mrf.mxu0 }
 0x14e   : > { %v1009_v19 = vadd.f32 %v2046_v48, %v1008_v18  ;;  %v1057_v20 = vpop.f32.mrf.mxu1 }
 0x14f   : > { %v1187_v29 = vmax.f32 %v1151_v16, 0.0 }
 0x150   : > { %v1058_v21 = vadd.f32 %v1057_v20, %v1009_v19 }
 0x152   : > { %v1103_v22 = vpop.f32.mrf.mxu2 }
 0x153   : > { %v1104_v23 = vadd.f32 %v1103_v22, %v1055_v10  ;;  %v1152_v24 = vpop.f32.mrf.mxu3 }
 0x155   : > { %v1153_v25 = vadd.f32 %v1152_v24, %v1104_v23  ;;  %v1010_v26 = vpop.f32.mrf.mxu0 }
 0x156   : > { %v1011_v27 = vadd.f32 %v2046_v48, %v1010_v26  ;;  %v1059_v28 = vpop.f32.mrf.mxu1 }
 0x157   : > { %v1188_v30 = vmax.f32 %v1153_v25, 0.0 }
 0x158   : > { %v1060_v31 = vadd.f32 %v1059_v28, %v1011_v27 }
 0x159   : > { %v2056_v32 = vpack.c.bf16 %v1188_v30, %v1187_v29 }
 0x15a   : > { %v1106_v33 = vpop.f32.mrf.mxu2 }
 0x15b   : > { %v1107_v34 = vadd.f32 %v1106_v33, %v1058_v21  ;;  %v1155_v35 = vpop.f32.mrf.mxu3 }
 0x15d   : > { %v1156_v36 = vadd.f32 %v1155_v35, %v1107_v34  ;;  %v1013_v37 = vpop.f32.mrf.mxu0 }
 0x15e   : > { %v1014_v38 = vadd.f32 %v2046_v48, %v1013_v37  ;;  %v1062_v39 = vpop.f32.mrf.mxu1 }
 0x15f   : > { %v1189_v46 = vmax.f32 %v1156_v36, 0.0 }
 0x160   : > { %v1063_v40 = vadd.f32 %v1062_v39, %v1014_v38 }
 0x162   : > { %v1108_v41 = vpop.f32.mrf.mxu2 }
 0x163   : > { %v1109_v42 = vadd.f32 %v1108_v41, %v1060_v31  ;;  %v1157_v3 = vpop.f32.mrf.mxu3 }
 0x165   : > { %v1158_v43 = vadd.f32 %v1157_v3, %v1109_v42  ;;  %v1015_v44 = vpop.f32.mrf.mxu0 }
 0x166   : > { %v1016_v45 = vadd.f32 %v2046_v48, %v1015_v44  ;;  %v1064_v5 = vpop.f32.mrf.mxu1 }
 0x167   : > { %v1190_v47 = vmax.f32 %v1158_v43, 0.0 }
 0x168   : > { %v1065_v49 = vadd.f32 %v1064_v5, %v1016_v45 }
 0x169   : > { %v2060_v15 = vpack.c.bf16 %v1190_v47, %v1189_v46 }
 0x16a   : > { %v1111_v50 = vpop.f32.mrf.mxu2 }
 0x16b   : > { %v1112_v51 = vadd.f32 %v1111_v50, %v1063_v40  ;;  %v1160_v52 = vpop.f32.mrf.mxu3 }
 0x16d   : > { %v1161_v17 = vadd.f32 %v1160_v52, %v1112_v51  ;;  %v1018_v53 = vpop.f32.mrf.mxu0 }
 0x16e   : > { %v1019_v54 = vadd.f32 %v2046_v48, %v1018_v53  ;;  %v1067_v55 = vpop.f32.mrf.mxu1 }
 0x16f   : > { %v1191_v0 = vmax.f32 %v1161_v17, 0.0 }
 0x170   : > { %v1068_v56 = vadd.f32 %v1067_v55, %v1019_v54 }
 0x172   : > { %v1113_v57 = vpop.f32.mrf.mxu2 }
 0x173   : > { %v1114_v58 = vadd.f32 %v1113_v57, %v1065_v49  ;;  %v1162_v59 = vpop.f32.mrf.mxu3 }
 0x175   : > { %v1163_v60 = vadd.f32 %v1162_v59, %v1114_v58  ;;  %v1020_v61 = vpop.f32.mrf.mxu0 }
 0x176   : > { %v1021_v62 = vadd.f32 %v2046_v48, %v1020_v61  ;;  %v1069_v63 = vpop.f32.mrf.mxu1 }
 0x177   : > { %v1192_v1 = vmax.f32 %v1163_v60, 0.0 }
 0x178   : > { %v1070_v2 = vadd.f32 %v1069_v63, %v1021_v62 }
 0x179   : > { %v2064_v4 = vpack.c.bf16 %v1192_v1, %v1191_v0 }
 0x17a   : > { %v1116_v6 = vpop.f32.mrf.mxu2 }
 0x17b   : > { %v1117_v7 = vadd.f32 %v1116_v6, %v1068_v56  ;;  %v1165_v8 = vpop.f32.mrf.mxu3 }
 0x17d   : > { %v1166_v9 = vadd.f32 %v1165_v8, %v1117_v7  ;;  %v1023_v10 = vpop.f32.mrf.mxu0 }
 0x17e   : > { %v1072_v12 = vpop.f32.mrf.mxu1  ;;  %v1024_v60 = vadd.f32 %v2046_v48, %v1023_v10  ;;  %v1772_v10 = vmov 0  }
 0x17f   : > { %v1193_v20 = vmax.f32 %v1166_v9, 0.0  ;;  %1665 = vset.pattern.permute.xlu0 %v1772_v10 }
 0x180   : > { %v1073_v1 = vadd.f32 %v1072_v12, %v1024_v60  ;;  %v1201_v12 = vld [vmem:[%s2116_s5] sm:$0x1] }
 0x182   : > { %v1118_v13 = vpop.f32.mrf.mxu2 }
 0x183   : > { %v1119_v14 = vadd.f32 %v1118_v13, %v1070_v2  ;;  %v1167_v16 = vpop.f32.mrf.mxu3 }
 0x185   : > { %v1168_v18 = vadd.f32 %v1167_v16, %v1119_v14  ;;  %v1025_v19 = vpop.f32.mrf.mxu0 }
 0x186   : > { %v1074_v22 = vpop.f32.mrf.mxu1  ;;  %v1026_v56 = vadd.f32 %v2046_v48, %v1025_v19 }
 0x187   : > { %v1194_v21 = vmax.f32 %v1168_v18, 0.0 }
 0x188   : > { %v1075_v63 = vadd.f32 %v1074_v22, %v1026_v56 }
 0x189   : > { %v1206_v23 = vpack.c.bf16 %v1194_v21, %v1193_v20 }
 0x18a   : > { %v1121_v24 = vpop.f32.mrf.mxu2 }
 0x18b   : > { %v1170_v25 = vpop.f32.mrf.mxu3  ;;  %v1122_v7 = vadd.f32 %v1121_v24, %v1073_v1 }
 0x18d   : > { %v1028_v26 = vpop.f32.mrf.mxu0  ;;  %v1171_v14 = vadd.f32 %v1170_v25, %v1122_v7 }
 0x18e   : > { %v1077_v27 = vpop.f32.mrf.mxu1  ;;  %v1029_v46 = vadd.f32 %v2046_v48, %v1028_v26 }
 0x18f   : > { %v1195_v18 = vmax.f32 %v1171_v14, 0.0 }
 0x190   : > { %v1078_v53 = vadd.f32 %v1077_v27, %v1029_v46 }
 0x192   : > { %v1123_v28 = vpop.f32.mrf.mxu2 }
 0x193   : > { %v1172_v29 = vpop.f32.mrf.mxu3  ;;  %v1124_v2 = vadd.f32 %v1123_v28, %v1075_v63 }
 0x195   : > { %v1030_v30 = vpop.f32.mrf.mxu0  ;;  %v1173_v9 = vadd.f32 %v1172_v29, %v1124_v2 }
 0x196   : > { %v1079_v34 = vpop.f32.mrf.mxu1  ;;  %v1031_v44 = vadd.f32 %v2046_v48, %v1030_v30 }
 0x197   : > { %v1196_v16 = vmax.f32 %v1173_v9, 0.0 }
 0x198   : > { %v1080_v50 = vadd.f32 %v1079_v34, %v1031_v44 }
 0x199   : > { %v1207_v19 = vpack.c.bf16 %v1196_v16, %v1195_v18 }
 0x19a   : > { %v1126_v31 = vpop.f32.mrf.mxu2 }
 0x19b   : > { %v1175_v33 = vpop.f32.mrf.mxu3  ;;  %v1127_v57 = vadd.f32 %v1126_v31, %v1078_v53 }
 0x19d   : > { %v1033_v35 = vpop.f32.mrf.mxu0  ;;  %v1176_v0 = vadd.f32 %v1175_v33, %v1127_v57 }
 0x19e   : > { %v1082_v38 = vpop.f32.mrf.mxu1  ;;  %v1034_v39 = vadd.f32 %v2046_v48, %v1033_v35 }
 0x19f   : > { %v1197_v8 = vmax.f32 %v1176_v0, 0.0 }
 0x1a0   : > { %v1083_v3 = vadd.f32 %v1082_v38, %v1034_v39 }
 0x1a2   : > { %v1128_v36 = vpop.f32.mrf.mxu2 }
 0x1a3   : > { %v1177_v37 = vpop.f32.mrf.mxu3  ;;  %v1129_v54 = vadd.f32 %v1128_v36, %v1080_v50 }
 0x1a5   : > { %v1035_v40 = vpop.f32.mrf.mxu0  ;;  %v1178_v61 = vadd.f32 %v1177_v37, %v1129_v54 }
 0x1a6   : > { %v1036_v43 = vadd.f32 %v2046_v48, %v1035_v40  ;;  %v1084_v5 = vpop.f32.mrf.mxu1  ;;  %v1210_v48 = vld [vmem:[#allocation2] sm:$0x1] }
 0x1a7   : > { %v1198_v6 = vmax.f32 %v1178_v61, 0.0  ;;  %1213 = vperm.xlu0 %1665, %v1210_v48  }
 0x1a8   : > { %v1085_v47 = vadd.f32 %v1084_v5, %v1036_v43 }
 0x1a9   : > { %v1208_v13 = vpack.c.bf16 %v1198_v6, %v1197_v8 }
 0x1aa   : > { %v1131_v41 = vpop.f32.mrf.mxu2 }
 0x1ab   : > { %v1180_v42 = vpop.f32.mrf.mxu3  ;;  %v1132_v45 = vadd.f32 %v1131_v41, %v1083_v3 }
 0x1ad   : > { %v1181_v51 = vadd.f32 %v1180_v42, %v1132_v45 }
 0x1af   : > { %v1199_v58 = vmax.f32 %v1181_v51, 0.0 }
 0x1b2   : > { %v1133_v49 = vpop.f32.mrf.mxu2 }
 0x1b3   : > { %v1134_v52 = vadd.f32 %v1133_v49, %v1085_v47  ;;  %v1182_v17 = vpop.f32.mrf.mxu3 }
 0x1b5   : > { %v1183_v55 = vadd.f32 %v1182_v17, %v1134_v52 }
 0x1b7   : > { %v1200_v59 = vmax.f32 %v1183_v55, 0.0 }
 0x1b9   : > { %v1209_v62 = vpack.c.bf16 %v1200_v59, %v1199_v58 }
 0x1bb   : > { %1217 = vmatpush.bf16.xpose.msra.mxu0 %v1209_v62 }
 0x1c3   : > { %1218 = vmatpush.bf16.xpose.msra.mxu0 %v1208_v13 }
 0x1cb   : > { %1219 = vmatpush.bf16.xpose.msra.mxu0 %v1207_v19 }
 0x1d3   : > { %1220 = vmatpush.bf16.xpose.msra.mxu0 %v1206_v23 }
 0x1db   : > { %1221 = vmatpush.bf16.xpose.msra.mxu0 %v2064_v4 }
 0x1e3   : > { %1222 = vmatpush.bf16.xpose.msra.mxu0 %v2060_v15 }
 0x1eb   : > { %1223 = vmatpush.bf16.xpose.msra.mxu0 %v2056_v32 }
 0x1f3   : > { %1224 = vmatpush.bf16.xpose.msra.mxu0 %v2052_v11 }
 0x1fa   : > { %1225 = vmatmul.bf16.vlgmr.msra.gmra.mxu0 %v1201_v12 }
 0x219   : > { %v1214_v20 = vpop.permute.xlu0 %1213 }
 0x21a   : > { %v1216_v21 = vperm.slane %v1214_v20, 0 }
 0x277   : > { %v1226_v22 = vpop.f32.mrf.mxu0 }
 0x278   : > { %v1227_v4 = vadd.f32 %v1226_v22, %v1216_v21 }
 0x27a   : > { %v1230_v23 = vsub.f32 0.0, %v1227_v4 }
 0x27c   : > { %v1231_v24 = vmul.f32 1.442695, %v1230_v23 }
 0x27e   : > { %1667 = vpow2.f32 %v1231_v24 }
 0x27f   : > { %v1228_v25 = vpop.f32.mrf.mxu0 }
 0x284   : > { %v1668_v15 = vpop.eup %1667 }
 0x285   : > { %v1233_v26 = vadd.f32 1.0, %v1668_v15 }
 0x287   : > { %1669 = vrcp.f32 %v1233_v26  ;;  %v1245_v28 = vand.u32 2147483648, %v1233_v26  ;;  %v1243_v30 = vand.u32 2147483647, %v1233_v26  ;;  %vm1239_vm2 = vweird.f32 %v1233_v26 }
 0x289   : > { %v1246_v33 = vor.u32 1.1754944e-38, %v1245_v28  ;;  %vm1244_vm4 = vcmp.eq.f32.partialorder %v1243_v30, 8.507059e+37 }
 0x28d   : > { %v1670_v32 = vpop.eup %1669 }
 0x28e   : > { %v1235_v11 = vmul.f32 %v1670_v32, %v1233_v26  ;;  %vm1240_vm1 = vweird.f32 %v1670_v32 }
 0x28f   : > { %vm1241_vm3 = vmor %vm1239_vm2, %vm1240_vm1 }
 0x290   : > { %v1236_v27 = vsub.f32 1.0, %v1235_v11 }
 0x292   : > { %v1237_v29 = vmul.f32 %v1670_v32, %v1236_v27 }
 0x294   : > { %v1238_v31 = vadd.f32 %v1670_v32, %v1237_v29 }
 0x296   : > { %v1242_v34 = vsel %vm1241_vm3, %v1670_v32, %v1238_v31 }
 0x297   : > { %v1247_v35 = vsel %vm1244_vm4, %v1246_v33, %v1242_v34 }
 0x298   : > { %1249 = vst [vmem:[%s290_s25] sm:$0x1] %v1247_v35 }
 0x299   : > { %1728 = shalt.err (!%p1725_p8)
}
 0x29a   : > { %1616 = dma.vmem_to_hbm [thread:$0]  (%p1854_p5), %s1262_s30, 16, %s1264_s9, %s1251_s22  }
 0x29b PF: > { %p1628_p9 = scmp.ge.s32.totalorder %s1767_s29, 2  ;;  %s1275_s19 = sand.u32 1, %s1755_s26  }
 0x29c   : > { %s1276_s20 = scalar_lea.sflag [#allocation5], %s1275_s19 }
 0x29d   : > { %p1623_p10 = pnand %p1628_p9, %p1858_p6 }
 0x29f   : > { %p1624_p11 = pneg %p1623_p10 }
 0x2a1   : > { %1750 = dma.done.wait (%p1624_p11), %s1276_s20, 16  }
 0x2a2   : > { %1752 = vsyncadd (%p1624_p11), %s1276_s20, 4294967280  ;;  %p20_p12 = scmp.ge.s32.totalorder %s1841_s8, 5   ;;  %s2121_s26 = smov %s1759_s27 }
 0x2a3   : > { %s2122_s27 = smov %s1763_s28  ;;  %s2123_s28 = smov %s1852_s11 }
 0x2a4   : > { %s2124_s29 = smov %s1841_s8  ;;  %22 = sbr.rel (!%p20_p12) target bundleno = 7 (0x7), region = 88 }
 0x2a9   :  { %1281 = vsyncpa [#allocation4], 1 }
 0x2aa   :  { %1283 = vsyncpa [#allocation4 + $0x1], 1 }
 0x2ab   :  { %1284 = vsyncpa [#allocation5], 1 }
 0x2ac   :  { %1286 = vsyncpa [#allocation5 + $0x1], 1 }

</bundles_post_ra>
